<compile_context>
chip_gen: v5e
topology: v5e:2x2
jax: 0.10.0
libtpu: 0.0.40
codegen_flags: <defaults>
</compile_context>

<pallas_src>
import functools

import jax
import jax.numpy as jnp
from jax import lax
from jax.experimental import pallas as pl
from jax.experimental.pallas import tpu as pltpu

LANE = 128          # TPU lane width
TARGET_ROWS = 4096  # rows/block: (4096,128) f32 = 2 MiB; 2x(2+2+0.5) MiB buffered


def _compute_and_store(est_ref, gt_ref, mask_ref, store, *, rows, block_rows):
    """Shared per-block masked reduction; `store(sum_d, sum_d2, cnt)` writes out.

    Each of sum_d / sum_d2 / cnt has shape (1, LANE), float32.
    """
    mv = mask_ref[...]
    m = mv if mv.dtype == jnp.bool_ else (mv != 0)

    def emit(mm):
        est = est_ref[...].astype(jnp.float32)
        gt = gt_ref[...].astype(jnp.float32)
        # Division result in masked-out / OOB lanes may be inf/NaN; the select
        # discards it (valid TPU select semantics), so log only sees >0 values.
        ratio = jnp.where(mm, est / gt, 1.0)
        d = jnp.log(ratio)
        store(jnp.sum(d, axis=0, keepdims=True),
              jnp.sum(d * d, axis=0, keepdims=True),
              jnp.sum(jnp.where(mm, 1.0, 0.0), axis=0, keepdims=True))

    if rows % block_rows == 0:
        emit(m)                                    # hot path: no tail masking at all
    else:
        num_blocks = -(-rows // block_rows)        # static python ints
        last = num_blocks - 1
        valid_last = rows - last * block_rows
        i = pl.program_id(0)

        @pl.when(i != last)
        def _():
            emit(m)

        @pl.when(i == last)
        def _():
            rid = lax.broadcasted_iota(jnp.int32, m.shape, 0)
            emit(jnp.logical_and(m, rid < valid_last))


def _silog_partials_kernel(est_ref, gt_ref, mask_ref, out_ref, *, rows, block_rows):
    """Per-block partials: out block (3, LANE) = [sum_d; sum_d2; count]."""
    def store(s_d, s_d2, cnt):
        out_ref[0:1, :] = s_d
        out_ref[1:2, :] = s_d2
        out_ref[2:3, :] = cnt

    _compute_and_store(est_ref, gt_ref, mask_ref, store,
                       rows=rows, block_rows=block_rows)


def _silog_accum_kernel(est_ref, gt_ref, mask_ref, out_ref, *, rows, block_rows):
    """Single resident (3, LANE) accumulator output (single-TensorCore chips)."""
    @pl.when(pl.program_id(0) == 0)
    def _():
        out_ref[...] = jnp.zeros_like(out_ref)

    def store(s_d, s_d2, cnt):
        out_ref[0:1, :] += s_d
        out_ref[1:2, :] += s_d2
        out_ref[2:3, :] += cnt

    _compute_and_store(est_ref, gt_ref, mask_ref, store,
                       rows=rows, block_rows=block_rows)


def _multi_tensorcore():
    """True on chips with >1 TensorCore per device (v7x / megacore parts):
    per-block partials + a "parallel" grid shard the stream across cores.
    Single-TC chips (v5e/v6e) prefer the in-kernel accumulator."""
    try:
        kind = jax.devices()[0].device_kind.lower()
    except Exception:
        return True
    single_tc = ("v5 lite" in kind) or ("v5e" in kind) or ("v6" in kind)
    return not single_tc


def silog_loss_pallas(depth_est, depth_gt, mask, variance_focus):
    n = depth_est.size

    est = jnp.ravel(depth_est)
    gt = jnp.ravel(depth_gt)
    msk = jnp.ravel(mask)                       # native dtype, no astype HBM pass

    # Only exotic dtypes are upcast in the wrapper; f32/bf16/f16 stream natively
    # and are cast to f32 in-kernel.
    native = (jnp.float32, jnp.bfloat16, jnp.float16)
    if est.dtype not in native:
        est = est.astype(jnp.float32)
    if gt.dtype not in native:
        gt = gt.astype(jnp.float32)

    rem = n % LANE
    n_main = n - rem

    tail = None
    if rem:
        # Rare: fold the <=127-element remainder into the wrapper sums instead
        # of jnp.pad-ing all three arrays through HBM.
        et = lax.slice(est, (n_main,), (n,)).astype(jnp.float32)
        gl = lax.slice(gt, (n_main,), (n,)).astype(jnp.float32)
        mt = lax.slice(msk, (n_main,), (n,))
        mt = mt if mt.dtype == jnp.bool_ else (mt != 0)
        dt = jnp.log(jnp.where(mt, et / gl, 1.0))
        tail = jnp.stack([jnp.sum(dt), jnp.sum(dt * dt),
                          jnp.sum(jnp.where(mt, 1.0, 0.0))])
        # TODO(synk): this prefix slice copies est/gt/mask once when
        # n % 128 != 0; avoiding it needs a relayout-free 1-D kernel path.
        est = lax.slice(est, (0,), (n_main,))
        gt = lax.slice(gt, (0,), (n_main,))
        msk = lax.slice(msk, (0,), (n_main,))

    if n_main == 0:
        sums = tail
    else:
        rows = n_main // LANE
        est2 = est.reshape(rows, LANE)          # free reshape of contiguous data
        gt2 = gt.reshape(rows, LANE)
        m2 = msk.reshape(rows, LANE)

        block_rows = min(TARGET_ROWS, rows)     # full dim for small inputs
        num_blocks = pl.cdiv(rows, block_rows)

        in_specs = [pl.BlockSpec((block_rows, LANE), lambda i: (i, 0))] * 3

        if _multi_tensorcore():
            kernel = functools.partial(_silog_partials_kernel,
                                       rows=rows, block_rows=block_rows)
            partials = pl.pallas_call(
                kernel,
                out_shape=jax.ShapeDtypeStruct((num_blocks, 3, LANE), jnp.float32),
                grid=(num_blocks,),
                in_specs=in_specs,
                out_specs=pl.BlockSpec((None, 3, LANE), lambda i: (i, 0, 0)),
                compiler_params=pltpu.CompilerParams(
                    dimension_semantics=("parallel",)),
            )(est2, gt2, m2)
            sums = jnp.sum(partials, axis=(0, 2))                     # (3,)
        else:
            kernel = functools.partial(_silog_accum_kernel,
                                       rows=rows, block_rows=block_rows)
            acc = pl.pallas_call(
                kernel,
                out_shape=jax.ShapeDtypeStruct((3, LANE), jnp.float32),
                grid=(num_blocks,),
                in_specs=in_specs,
                out_specs=pl.BlockSpec((3, LANE), lambda i: (0, 0)),
                compiler_params=pltpu.CompilerParams(
                    dimension_semantics=("arbitrary",)),
            )(est2, gt2, m2)
            sums = jnp.sum(acc, axis=-1)                              # (3,)

        if tail is not None:
            sums = sums + tail

    cnt = sums[2]                      # all-False mask -> 0/0 NaN, as in PyTorch
    mean_d = sums[0] / cnt
    mean_d2 = sums[1] / cnt
    # NOTE: like PyTorch, no clamp before sqrt.
    return jnp.sqrt(mean_d2 - variance_focus * mean_d * mean_d) * 10.0


def silog_loss_ref(depth_est, depth_gt, mask, variance_focus):
    """Pure-JAX reference mirroring the PyTorch module exactly."""
    m = jnp.ravel(mask).astype(bool)
    est = jnp.ravel(depth_est).astype(jnp.float32)
    gt = jnp.ravel(depth_gt).astype(jnp.float32)
    d = (jnp.log(jnp.where(m, est, 1.0))
         - jnp.log(jnp.where(m, gt, 1.0))) * m.astype(jnp.float32)
    cnt = jnp.sum(m.astype(jnp.float32))
    mean_d = jnp.sum(d) / cnt
    mean_d2 = jnp.sum(d * d) / cnt
    return jnp.sqrt(mean_d2 - variance_focus * mean_d ** 2) * 10.0


if __name__ == "__main__":
    key = jax.random.PRNGKey(0)
    k1, k2, k3 = jax.random.split(key, 3)

    # Small depth-map-like inputs, NCHW.
    N, C, H, W = 2, 4, 16, 16
    depth_est = jax.random.uniform(k1, (N, C, H, W), jnp.float32, 0.5, 10.0)
    depth_gt = jax.random.uniform(k2, (N, C, H, W), jnp.float32, 0.5, 10.0)
    mask = jax.random.uniform(k3, (N, C, H, W), jnp.float32) > 0.3  # bool mask

    variance_focus = 0.85  # deterministic "parameter" from __init__

    loss = silog_loss_pallas(depth_est, depth_gt, mask, variance_focus)
    loss = jax.block_until_ready(loss)

    ref = silog_loss_ref(depth_est, depth_gt, mask, variance_focus)
    assert jnp.allclose(loss, ref, rtol=1e-4, atol=1e-4), (loss, ref)

    print("KERNEL_OK")
</pallas_src>

<mosaic_0001>
module attributes {stable_mosaic.version = 11 : i64} {
  func.func @_silog_partials_kernel(%arg0: i32, %arg1: memref<16x128xf32, #tpu.memory_space<vmem>>, %arg2: memref<16x128xf32, #tpu.memory_space<vmem>>, %arg3: memref<16x128xi32, #tpu.memory_space<vmem>>, %arg4: memref<1x3x128xf32, #tpu.memory_space<vmem>>) attributes {dimension_semantics = [#tpu.dimension_semantics<parallel>], iteration_bounds = array<i64: 1>, scalar_prefetch = 0 : i64, scratch_operands = 0 : i64, tpu.core_type = #tpu.core_type<tc>, window_params = [{transform_indices = @transform_0, window_bounds = array<i64: 16, 128>}, {transform_indices = @transform_1, window_bounds = array<i64: 16, 128>}, {transform_indices = @transform_2, window_bounds = array<i64: 16, 128>}, {transform_indices = @transform_3, window_bounds = array<i64: 1, 3, 128>}]} {
    %c0 = arith.constant 0 : index
    %c0_0 = arith.constant 0 : index
    %0 = vector.load %arg3[%c0, %c0_0] : memref<16x128xi32, #tpu.memory_space<vmem>>, vector<16x128xi32>
    %cst = arith.constant dense<0> : vector<16x128xi32>
    %1 = arith.cmpi ne, %0, %cst : vector<16x128xi32>
    %c0_1 = arith.constant 0 : index
    %c0_2 = arith.constant 0 : index
    %2 = vector.load %arg1[%c0_1, %c0_2] : memref<16x128xf32, #tpu.memory_space<vmem>>, vector<16x128xf32>
    %c0_3 = arith.constant 0 : index
    %c0_4 = arith.constant 0 : index
    %3 = vector.load %arg2[%c0_3, %c0_4] : memref<16x128xf32, #tpu.memory_space<vmem>>, vector<16x128xf32>
    %4 = arith.divf %2, %3 : vector<16x128xf32>
    %cst_5 = arith.constant 1.000000e+00 : f32
    %5 = vector.broadcast %cst_5 : f32 to vector<16x128xf32>
    %6 = arith.select %1, %4, %5 : vector<16x128xi1>, vector<16x128xf32>
    %7 = math.log %6 : vector<16x128xf32>
    %cst_6 = arith.constant dense<0.000000e+00> : vector<128xf32>
    %8 = vector.multi_reduction <add>, %7, %cst_6 [0] : vector<16x128xf32> to vector<128xf32>
    %9 = vector.shape_cast %8 : vector<128xf32> to vector<1x128xf32>
    %10 = arith.mulf %7, %7 : vector<16x128xf32>
    %cst_7 = arith.constant dense<0.000000e+00> : vector<128xf32>
    %11 = vector.multi_reduction <add>, %10, %cst_7 [0] : vector<16x128xf32> to vector<128xf32>
    %12 = vector.shape_cast %11 : vector<128xf32> to vector<1x128xf32>
    %cst_8 = arith.constant 1.000000e+00 : f32
    %cst_9 = arith.constant 0.000000e+00 : f32
    %13 = vector.broadcast %cst_8 : f32 to vector<16x128xf32>
    %14 = vector.broadcast %cst_9 : f32 to vector<16x128xf32>
    %15 = arith.select %1, %13, %14 : vector<16x128xi1>, vector<16x128xf32>
    %cst_10 = arith.constant dense<0.000000e+00> : vector<128xf32>
    %16 = vector.multi_reduction <add>, %15, %cst_10 [0] : vector<16x128xf32> to vector<128xf32>
    %17 = vector.shape_cast %16 : vector<128xf32> to vector<1x128xf32>
    %c0_11 = arith.constant 0 : index
    %c0_12 = arith.constant 0 : index
    %c0_13 = arith.constant 0 : index
    %18 = vector.load %arg4[%c0_11, %c0_12, %c0_13] : memref<1x3x128xf32, #tpu.memory_space<vmem>>, vector<1x1x128xf32>
    %19 = vector.shape_cast %18 : vector<1x1x128xf32> to vector<1x128xf32>
    %20 = vector.shape_cast %9 : vector<1x128xf32> to vector<1x1x128xf32>
    tpu.vector_store %arg4[%c0_11, %c0_12, %c0_13], %20 {strides = array<i32>} : memref<1x3x128xf32, #tpu.memory_space<vmem>>, vector<1x1x128xf32>,
    %c0_14 = arith.constant 0 : index
    %c1 = arith.constant 1 : index
    %c0_15 = arith.constant 0 : index
    %21 = vector.load %arg4[%c0_14, %c1, %c0_15] : memref<1x3x128xf32, #tpu.memory_space<vmem>>, vector<1x1x128xf32>
    %22 = vector.shape_cast %21 : vector<1x1x128xf32> to vector<1x128xf32>
    %23 = vector.shape_cast %12 : vector<1x128xf32> to vector<1x1x128xf32>
    tpu.vector_store %arg4[%c0_14, %c1, %c0_15], %23 {strides = array<i32>} : memref<1x3x128xf32, #tpu.memory_space<vmem>>, vector<1x1x128xf32>,
    %c0_16 = arith.constant 0 : index
    %c2 = arith.constant 2 : index
    %c0_17 = arith.constant 0 : index
    %24 = vector.load %arg4[%c0_16, %c2, %c0_17] : memref<1x3x128xf32, #tpu.memory_space<vmem>>, vector<1x1x128xf32>
    %25 = vector.shape_cast %24 : vector<1x1x128xf32> to vector<1x128xf32>
    %26 = vector.shape_cast %17 : vector<1x128xf32> to vector<1x1x128xf32>
    tpu.vector_store %arg4[%c0_16, %c2, %c0_17], %26 {strides = array<i32>} : memref<1x3x128xf32, #tpu.memory_space<vmem>>, vector<1x1x128xf32>,
    return
  }
  func.func @transform_0(%arg0: i32) -> (i32, i32) {
    %c0_i32 = arith.constant 0 : i32
    %c0_i32_0 = arith.constant 0 : i32
    return %arg0, %c0_i32 : i32, i32
  }
  func.func @transform_1(%arg0: i32) -> (i32, i32) {
    %c0_i32 = arith.constant 0 : i32
    %c0_i32_0 = arith.constant 0 : i32
    return %arg0, %c0_i32 : i32, i32
  }
  func.func @transform_2(%arg0: i32) -> (i32, i32) {
    %c0_i32 = arith.constant 0 : i32
    %c0_i32_0 = arith.constant 0 : i32
    return %arg0, %c0_i32 : i32, i32
  }
  func.func @transform_3(%arg0: i32) -> (i32, i32, i32) {
    %c0_i32 = arith.constant 0 : i32
    %c0_i32_0 = arith.constant 0 : i32
    %c0_i32_1 = arith.constant 0 : i32
    return %arg0, %c0_i32, %c0_i32_0 : i32, i32, i32
  }
}

</mosaic_0001>

<bundles_post_ra>
// kernel: tpu_custom_call.1
= control target key start
LH: loop header
LB: loop body
LE: loop exit
PB: predicated region body
PF: predicated region fallthrough
CT: control target
= control target key end

     0   :  { %8 = vsyncpa [#allocation3], 0  ;;  %s145_s15 = smov [#allocation2]   ;;  %s146_s17 = smov 128   ;;  %s197_s0 = inlined_call_operand.vmem [shape: f32[16,128], index: 0, kind: input, shape index: {}]   ;;  %s198_s1 = inlined_call_operand.hbm [shape: f32[16,128], index: 1, kind: input, shape index: {}]   ;;  %s199_s2 = inlined_call_operand.vmem [shape: s32[16,128], index: 2, kind: input, shape index: {}]   ;;  %s200_s3 = inlined_call_operand.vmem [shape: f32[1,3,128], index: 3, kind: output, shape index: {}]  }
   0x1   :  { %s15_s14 = sshll.u32 %s198_s1, 4  ;;  %s17_s16 = sshll.u32 %s145_s15, 4  ;;  %s16_s14 = int_to_ptr.hbm [resolvable:$true] %s15_s14  ;;  %s18_s16 = int_to_ptr.vmem [resolvable:$true] %s17_s16 }
   0x2   :  { %s147_s18 = smov 8  }
   0x3   :  { %23 = dma.hbm_to_vmem [thread:$0]  %s16_s14, 256, %s18_s16, [#allocation3], %s146_s17, %s146_s17, %s147_s18  }
   0x4   :  { %143 = dma.done.wait [#allocation3], 256  }
   0x5   :  { %144 = vsyncadd [#allocation3], 4294967040  ;;  %v30_v0 = vld [vmem:[%s199_s2] sm:$0xff]  ;;  %v31_v1 = vld [vmem:[%s199_s2 + $0x8] sm:$0xff]  ;;  %v148_v4 = vmov 0.0  }
   0x6   :  { %v36_v2 = vld [vmem:[#allocation2] sm:$0xff]  ;;  %v37_v3 = vld [vmem:[#allocation2 + $0x8] sm:$0xff]  ;;  %vm32_vm0 = vcmp.ne.s32.totalorder %v30_v0, 0  ;;  %vm33_vm1 = vcmp.ne.s32.totalorder %v31_v1, 0 }
   0x7   :  { %111 = vrcp.f32 %v36_v2  ;;  %v90_v5 = vsel %vm32_vm0, 1.0, %v148_v4  ;;  %v91_v6 = vsel %vm33_vm1, 1.0, %v148_v4  ;;  %vm43_vm2 = vweird.f32 %v36_v2  ;;  %v34_v28 = vld [vmem:[%s197_s0] sm:$0xff]  ;;  %v35_v30 = vld [vmem:[%s197_s0 + $0x8] sm:$0xff] }
   0x8   :  { %113 = vrcp.f32 %v37_v3  ;;  %v92_v7 = vadd.f32 %v91_v6, %v90_v5  ;;  %v47_v13 = vand.u32 2147483647, %v36_v2  ;;  %v49_v14 = vand.u32 2147483648, %v36_v2 }
   0x9   :  { %v64_v17 = vand.u32 2147483648, %v37_v3  ;;  %vm58_vm4 = vweird.f32 %v37_v3  ;;  %v62_v20 = vand.u32 2147483647, %v37_v3 }
   0xa   :  { %v93_v8 = vrot.slane %v92_v7, 4  ;;  %v50_v23 = vor.u32 1.1754944e-38, %v49_v14  ;;  %vm48_vm7 = vcmp.eq.f32.partialorder %v47_v13, 8.507059e+37 }
   0xb   :  { %v65_v26 = vor.u32 1.1754944e-38, %v64_v17  ;;  %vm63_vm9 = vcmp.eq.f32.partialorder %v62_v20, 8.507059e+37 }
   0xc   :  { %v94_v12 = vadd.f32 %v93_v8, %v92_v7 }
   0xd   :  { %v112_v9 = vpop.eup %111 }
   0xe   :  { %v114_v10 = vpop.eup %113  ;;  %v39_v11 = vmul.f32 %v112_v9, %v36_v2  ;;  %vm44_vm3 = vweird.f32 %v112_v9  ;;  %v95_v18 = vrot.slane %v94_v12, 2 }
   0xf   :  { %v54_v15 = vmul.f32 %v114_v10, %v37_v3  ;;  %vm59_vm5 = vweird.f32 %v114_v10  ;;  %vm45_vm6 = vmor %vm43_vm2, %vm44_vm3 }
  0x10   :  { %v40_v16 = vsub.f32 1.0, %v39_v11  ;;  %v96_v22 = vadd.f32 %v95_v18, %v94_v12  ;;  %vm60_vm8 = vmor %vm58_vm4, %vm59_vm5 }
  0x11   :  { %v55_v19 = vsub.f32 1.0, %v54_v15 }
  0x12   :  { %v41_v21 = vmul.f32 %v112_v9, %v40_v16  ;;  %v97_v27 = vrot.slane %v96_v22, 1 }
  0x13   :  { %v56_v24 = vmul.f32 %v114_v10, %v55_v19 }
  0x14   :  { %v42_v25 = vadd.f32 %v112_v9, %v41_v21  ;;  %v98_v32 = vadd.f32 %v97_v27, %v96_v22 }
  0x15   :  { %v57_v29 = vadd.f32 %v114_v10, %v56_v24 }
  0x16   :  { %v46_v31 = vsel %vm45_vm6, %v112_v9, %v42_v25  ;;  %101 = vst [vmem:[%s200_s3 + $0x2] sm:$0x1] %v98_v32 }
  0x17   :  { %v51_v33 = vsel %vm48_vm7, %v50_v23, %v46_v31  ;;  %v61_v34 = vsel %vm60_vm8, %v114_v10, %v57_v29 }
  0x18   :  { %v52_v35 = vmul.f32 %v51_v33, %v34_v28  ;;  %v66_v36 = vsel %vm63_vm9, %v65_v26, %v61_v34 }
  0x19   :  { %v67_v37 = vmul.f32 %v66_v36, %v35_v30 }
  0x1a   :  { %v68_v38 = vsel %vm32_vm0, %v52_v35, 1.0 }
  0x1b   :  { %v69_v39 = vsel %vm33_vm1, %v67_v37, 1.0  ;;  %115 = vlog2.f32 %v68_v38 }
  0x1c   :  { %117 = vlog2.f32 %v69_v39 }
  0x21   :  { %v116_v40 = vpop.eup %115 }
  0x22   :  { %v118_v41 = vpop.eup %117  ;;  %v71_v42 = vmul.f32 0.6931472, %v116_v40 }
  0x23   :  { %v73_v43 = vmul.f32 0.6931472, %v118_v41 }
  0x24   :  { %v81_v44 = vmul.f32 %v71_v42, %v71_v42 }
  0x25   :  { %v74_v45 = vadd.f32 %v73_v43, %v71_v42  ;;  %v82_v46 = vmul.f32 %v73_v43, %v73_v43 }
  0x27   :  { %v75_v47 = vrot.slane %v74_v45, 4  ;;  %v83_v48 = vadd.f32 %v82_v46, %v81_v44 }
  0x29   :  { %v76_v49 = vadd.f32 %v75_v47, %v74_v45  ;;  %v84_v50 = vrot.slane %v83_v48, 4 }
  0x2b   :  { %v77_v51 = vrot.slane %v76_v49, 2  ;;  %v85_v52 = vadd.f32 %v84_v50, %v83_v48 }
  0x2d   :  { %v78_v53 = vadd.f32 %v77_v51, %v76_v49  ;;  %v86_v54 = vrot.slane %v85_v52, 2 }
  0x2f   :  { %v79_v55 = vrot.slane %v78_v53, 1  ;;  %v87_v56 = vadd.f32 %v86_v54, %v85_v52 }
  0x31   :  { %v80_v57 = vadd.f32 %v79_v55, %v78_v53  ;;  %v88_v58 = vrot.slane %v87_v56, 1 }
  0x33   :  { %99 = vst [vmem:[%s200_s3] sm:$0x1] %v80_v57  ;;  %v89_v59 = vadd.f32 %v88_v58, %v87_v56 }
  0x35   :  { %100 = vst [vmem:[%s200_s3 + $0x1] sm:$0x1] %v89_v59 }
  0x36   :  { %106 = vsyncpa [#allocation3], 1 }

</bundles_post_ra>
